<compile_context>
chip_gen: v6e
topology: v6e:2x2x1
jax: 0.10.0
libtpu: 0.0.40
codegen_flags: <defaults>
</compile_context>

<pallas_src>
import jax
import jax.numpy as jnp
from jax.experimental import pallas as pl
from jax.experimental.pallas import tpu as pltpu

_LANE = 128
_MAX_K_TILE = 1024  # K tile when streaming the first-layer weight


def _round_up(x, m):
    return ((x + m - 1) // m) * m


def _pick_k_tile(d_in):
    """Largest K tile that is a multiple of 128 and divides d_in exactly.

    Exact division is required so no K block is partial (garbage in a partial
    K block would corrupt the accumulator). Small d_in -> single K block.
    """
    if d_in <= 2 * _MAX_K_TILE:
        return d_in
    for t in range(_MAX_K_TILE, 0, -_LANE):
        if d_in % t == 0:
            return t
    # TODO(synk): for large d_in not divisible by 128, pad the feature dim once
    # in prepare_params instead of falling back to one monolithic K block.
    return d_in


def _default_batch_tile():
    try:
        kind = jax.devices()[0].device_kind.lower()
        if "v5" in kind or "v6" in kind:
            return 512      # 128 MiB VMEM: larger M tile amortizes grid-step overhead
    except Exception:
        pass
    return 256              # v7x (64 MiB VMEM) and unknown chips


def _discriminator_kernel(x_ref, w1_ref, b1_ref, w2_ref, b2_ref,
                          w3_ref, b3_ref, o_ref, acc_ref):
    # x: (tb, tk) f32; w1: (tk, 512) bf16 streamed over K; w2/w3 resident bf16;
    # biases f32; acc: (tb, 512) f32 scratch; output block: (tb, 1) f32.
    k = pl.program_id(1)

    @pl.when(k == 0)
    def _init():
        acc_ref[...] = jnp.zeros_like(acc_ref)

    # Layer 1, K-streamed. The f32 -> bf16 cast is fused here (no wrapper op).
    x = x_ref[...].astype(jnp.bfloat16)
    acc_ref[...] += jnp.dot(x, w1_ref[...], preferred_element_type=jnp.float32)

    @pl.when(k == pl.num_programs(1) - 1)
    def _finalize():
        h1 = acc_ref[...] + b1_ref[...]
        h1 = jnp.where(h1 > 0, h1, 0.2 * h1)                     # LeakyReLU(0.2)

        h2 = jnp.dot(h1.astype(jnp.bfloat16), w2_ref[...],
                     preferred_element_type=jnp.float32) + b2_ref[...]
        h2 = jnp.where(h2 > 0, h2, 0.2 * h2)                     # LeakyReLU(0.2)

        # Final layer on 128 padded output lanes (one MXU pass); only lane 0 is
        # real.  Bias/sigmoid/store happen on that single column -> the HBM
        # writeback is (tb, 1) instead of (tb, 128).
        logit = jnp.dot(h2.astype(jnp.bfloat16), w3_ref[...],
                        preferred_element_type=jnp.float32)
        logit = logit[:, :1] + b3_ref[...]                        # (tb, 1)
        o_ref[...] = jax.nn.sigmoid(logit)


def prepare_params(params):
    """One-time parameter preparation (hoisted off the per-call path):
    bf16 weights for the MXU, f32 biases, final layer padded to 128 lanes."""
    w1, b1, w2, b2, w3, b3 = params
    w1 = w1.astype(jnp.bfloat16)
    w2 = w2.astype(jnp.bfloat16)
    w3p = jnp.zeros((w3.shape[0], _LANE), jnp.bfloat16).at[:, :1].set(
        w3.astype(jnp.bfloat16))
    b1 = b1.reshape(1, -1).astype(jnp.float32)
    b2 = b2.reshape(1, -1).astype(jnp.float32)
    b3 = b3.reshape(1, 1).astype(jnp.float32)
    return (w1, b1, w2, b2, w3p, b3)


def discriminator_forward(img, prepared_params, *, batch_tile=None):
    """img: (B, C, H, W) float32. prepared_params: output of prepare_params().
    Returns (B, 1) validity in [0, 1] (float32)."""
    w1, b1, w2, b2, w3p, b3 = prepared_params
    b = img.shape[0]
    d_in = w1.shape[0]
    h1_dim, h2_dim = w1.shape[1], w2.shape[1]

    # Flatten only (no copy, no cast); bf16 cast is fused inside the kernel.
    x = img.reshape(b, d_in)

    if batch_tile is None:
        batch_tile = _default_batch_tile()

    # Batch (M) tile: multiple of 16 sublanes; aim for >=2 grid steps when the
    # batch allows it so both TensorCores (v7x) get work.
    if b < 2 * batch_tile:
        tb = min(batch_tile, max(16, _round_up(pl.cdiv(b, 2), 16)))
    else:
        tb = batch_tile
    nb = pl.cdiv(b, tb)          # partial last tile handled by Pallas (no jnp.pad)

    tk = _pick_k_tile(d_in)      # divides d_in exactly
    nk = d_in // tk

    resident = lambda shape: pl.BlockSpec(shape, lambda i, k: (0, 0))

    out = pl.pallas_call(
        _discriminator_kernel,
        out_shape=jax.ShapeDtypeStruct((b, 1), jnp.float32),
        grid=(nb, nk),
        in_specs=[
            pl.BlockSpec((tb, tk), lambda i, k: (i, k)),       # x: tiled (M, K)
            pl.BlockSpec((tk, h1_dim), lambda i, k: (k, 0)),   # w1: streamed over K
            resident((1, h1_dim)),                             # b1
            resident((h1_dim, h2_dim)),                        # w2
            resident((1, h2_dim)),                             # b2
            resident((h2_dim, _LANE)),                         # w3 (lane-padded)
            resident((1, 1)),                                  # b3
        ],
        out_specs=pl.BlockSpec((tb, 1), lambda i, k: (i, 0)),
        scratch_shapes=[pltpu.VMEM((tb, h1_dim), jnp.float32)],
        compiler_params=pltpu.CompilerParams(
            dimension_semantics=("parallel", "arbitrary"),
            vmem_limit_bytes=48 * 1024 * 1024,
        ),
    )(x, w1, b1, w2, b2, w3p, b3)

    return out


def init_params(key, d_in):
    """Deterministic init mirroring nn.Linear default (uniform +-1/sqrt(fan_in))."""
    ks = jax.random.split(key, 6)

    def lin(kw, kb, fan_in, fan_out):
        bound = 1.0 / jnp.sqrt(fan_in)
        w = jax.random.uniform(kw, (fan_in, fan_out), jnp.float32, -bound, bound)
        b = jax.random.uniform(kb, (1, fan_out), jnp.float32, -bound, bound)
        return w, b

    w1, b1 = lin(ks[0], ks[1], d_in, 512)
    w2, b2 = lin(ks[2], ks[3], 512, 256)
    w3, b3 = lin(ks[4], ks[5], 256, 1)
    return (w1, b1, w2, b2, w3, b3)


if __name__ == "__main__":
    # Small shapes consistent with the module: channels=1, img_size=16
    # => flattened feature dim = 1*16*16 = 256.
    B, C, H, W = 2, 1, 16, 16
    key = jax.random.PRNGKey(0)
    k_img, k_par = jax.random.split(key)

    img = jax.random.normal(k_img, (B, C, H, W), dtype=jnp.float32)
    params = init_params(k_par, C * H * W)
    prepared = prepare_params(params)        # one-time (off the hot path)

    out = discriminator_forward(img, prepared)
    out = jax.block_until_ready(out)

    # Pure-JAX f32 reference (loose tolerance: kernel matmuls run in bf16).
    w1, b1, w2, b2, w3, b3 = params
    xf = img.reshape(B, -1)
    h1 = xf @ w1 + b1
    h1 = jnp.where(h1 > 0, h1, 0.2 * h1)
    h2 = h1 @ w2 + b2
    h2 = jnp.where(h2 > 0, h2, 0.2 * h2)
    ref = jax.nn.sigmoid(h2 @ w3 + b3)

    assert out.shape == (B, 1)
    assert bool(jnp.all((out >= 0.0) & (out <= 1.0)))
    assert bool(jnp.all(jnp.abs(out - ref) < 5e-2)), float(jnp.max(jnp.abs(out - ref)))
    print("KERNEL_OK")
</pallas_src>

<mosaic_0001>
module attributes {stable_mosaic.version = 11 : i64} {
  func.func @_discriminator_kernel(%arg0: i32, %arg1: i32, %arg2: memref<16x256xf32, #tpu.memory_space<vmem>>, %arg3: memref<256x512xbf16, #tpu.memory_space<vmem>>, %arg4: memref<1x512xf32, #tpu.memory_space<vmem>>, %arg5: memref<512x256xbf16, #tpu.memory_space<vmem>>, %arg6: memref<1x256xf32, #tpu.memory_space<vmem>>, %arg7: memref<256x128xbf16, #tpu.memory_space<vmem>>, %arg8: memref<1x1xf32, #tpu.memory_space<vmem>>, %arg9: memref<16x1xf32, #tpu.memory_space<vmem>>, %arg10: memref<16x512xf32, #tpu.memory_space<vmem>>) attributes {dimension_semantics = [#tpu.dimension_semantics<parallel>, #tpu.dimension_semantics<arbitrary>], iteration_bounds = array<i64: 1, 1>, scalar_prefetch = 0 : i64, scratch_operands = 1 : i64, tpu.core_type = #tpu.core_type<tc>, window_params = [{transform_indices = @transform_0, window_bounds = array<i64: 16, 256>}, {transform_indices = @transform_1, window_bounds = array<i64: 256, 512>}, {pipeline_mode = #tpu.pipeline_mode<synchronous>, transform_indices = @transform_2, window_bounds = array<i64: 1, 512>}, {pipeline_mode = #tpu.pipeline_mode<synchronous>, transform_indices = @transform_3, window_bounds = array<i64: 512, 256>}, {pipeline_mode = #tpu.pipeline_mode<synchronous>, transform_indices = @transform_4, window_bounds = array<i64: 1, 256>}, {pipeline_mode = #tpu.pipeline_mode<synchronous>, transform_indices = @transform_5, window_bounds = array<i64: 256, 128>}, {pipeline_mode = #tpu.pipeline_mode<synchronous>, transform_indices = @transform_6, window_bounds = array<i64: 1, 1>}, {transform_indices = @transform_7, window_bounds = array<i64: 16, 1>}]} {
    %c0_i32 = arith.constant 0 : i32
    %0 = arith.cmpi eq, %arg1, %c0_i32 : i32
    %1 = arith.extui %0 : i1 to i32
    %c0_i32_0 = arith.constant 0 : i32
    %2 = arith.cmpi ne, %1, %c0_i32_0 : i32
    scf.if %2 {
      %cst_10 = arith.constant 0.000000e+00 : f32
      %13 = vector.broadcast %cst_10 : f32 to vector<16x512xf32>
      %c0_11 = arith.constant 0 : index
      %c0_12 = arith.constant 0 : index
      %14 = vector.load %arg10[%c0_11, %c0_12] : memref<16x512xf32, #tpu.memory_space<vmem>>, vector<16x512xf32>
      tpu.vector_store %arg10[%c0_11, %c0_12], %13 {strides = array<i32>} : memref<16x512xf32, #tpu.memory_space<vmem>>, vector<16x512xf32>,
    } else {
    }
    %c0 = arith.constant 0 : index
    %c0_1 = arith.constant 0 : index
    %3 = vector.load %arg2[%c0, %c0_1] : memref<16x256xf32, #tpu.memory_space<vmem>>, vector<16x256xf32>
    %4 = arith.truncf %3 : vector<16x256xf32> to vector<16x256xbf16>
    %c0_2 = arith.constant 0 : index
    %c0_3 = arith.constant 0 : index
    %5 = vector.load %arg10[%c0_2, %c0_3] : memref<16x512xf32, #tpu.memory_space<vmem>>, vector<16x512xf32>
    %c0_4 = arith.constant 0 : index
    %c0_5 = arith.constant 0 : index
    %6 = vector.load %arg3[%c0_4, %c0_5] : memref<256x512xbf16, #tpu.memory_space<vmem>>, vector<256x512xbf16>
    %cst = arith.constant dense<0.000000e+00> : vector<16x512xf32>
    %7 = tpu.matmul %4, %6, %cst {dimension_numbers = #tpu.dot_dimension_numbers<[1], [0], [0], [1], [0, 0, 1, 1], [], []>} : vector<16x256xbf16>, vector<256x512xbf16>, vector<16x512xf32> -> vector<16x512xf32>
    %8 = arith.addf %5, %7 : vector<16x512xf32>
    %c0_6 = arith.constant 0 : index
    %c0_7 = arith.constant 0 : index
    %9 = vector.load %arg10[%c0_6, %c0_7] : memref<16x512xf32, #tpu.memory_space<vmem>>, vector<16x512xf32>
    tpu.vector_store %arg10[%c0_6, %c0_7], %8 {strides = array<i32>} : memref<16x512xf32, #tpu.memory_space<vmem>>, vector<16x512xf32>,
    %c0_i32_8 = arith.constant 0 : i32
    %10 = arith.cmpi eq, %arg1, %c0_i32_8 : i32
    %11 = arith.extui %10 : i1 to i32
    %c0_i32_9 = arith.constant 0 : i32
    %12 = arith.cmpi ne, %11, %c0_i32_9 : i32
    scf.if %12 {
      %c0_10 = arith.constant 0 : index
      %c0_11 = arith.constant 0 : index
      %13 = vector.load %arg10[%c0_10, %c0_11] : memref<16x512xf32, #tpu.memory_space<vmem>>, vector<16x512xf32>
      %c0_12 = arith.constant 0 : index
      %c0_13 = arith.constant 0 : index
      %14 = vector.load %arg4[%c0_12, %c0_13] : memref<1x512xf32, #tpu.memory_space<vmem>>, vector<1x512xf32>
      %15 = vector.broadcast %14 : vector<1x512xf32> to vector<16x512xf32>
      %16 = arith.addf %13, %15 : vector<16x512xf32>
      %cst_14 = arith.constant 0.000000e+00 : f32
      %17 = vector.broadcast %cst_14 : f32 to vector<16x512xf32>
      %18 = arith.cmpf ogt, %16, %17 : vector<16x512xf32>
      %cst_15 = arith.constant 2.000000e-01 : f32
      %19 = vector.broadcast %cst_15 : f32 to vector<16x512xf32>
      %20 = arith.mulf %19, %16 : vector<16x512xf32>
      %21 = arith.select %18, %16, %20 : vector<16x512xi1>, vector<16x512xf32>
      %22 = arith.truncf %21 : vector<16x512xf32> to vector<16x512xbf16>
      %c0_16 = arith.constant 0 : index
      %c0_17 = arith.constant 0 : index
      %23 = vector.load %arg5[%c0_16, %c0_17] : memref<512x256xbf16, #tpu.memory_space<vmem>>, vector<512x256xbf16>
      %cst_18 = arith.constant dense<0.000000e+00> : vector<16x256xf32>
      %24 = tpu.matmul %22, %23, %cst_18 {dimension_numbers = #tpu.dot_dimension_numbers<[1], [0], [0], [1], [0, 0, 1, 1], [], []>} : vector<16x512xbf16>, vector<512x256xbf16>, vector<16x256xf32> -> vector<16x256xf32>
      %c0_19 = arith.constant 0 : index
      %c0_20 = arith.constant 0 : index
      %25 = vector.load %arg6[%c0_19, %c0_20] : memref<1x256xf32, #tpu.memory_space<vmem>>, vector<1x256xf32>
      %26 = vector.broadcast %25 : vector<1x256xf32> to vector<16x256xf32>
      %27 = arith.addf %24, %26 : vector<16x256xf32>
      %cst_21 = arith.constant 0.000000e+00 : f32
      %28 = vector.broadcast %cst_21 : f32 to vector<16x256xf32>
      %29 = arith.cmpf ogt, %27, %28 : vector<16x256xf32>
      %cst_22 = arith.constant 2.000000e-01 : f32
      %30 = vector.broadcast %cst_22 : f32 to vector<16x256xf32>
      %31 = arith.mulf %30, %27 : vector<16x256xf32>
      %32 = arith.select %29, %27, %31 : vector<16x256xi1>, vector<16x256xf32>
      %33 = arith.truncf %32 : vector<16x256xf32> to vector<16x256xbf16>
      %c0_23 = arith.constant 0 : index
      %c0_24 = arith.constant 0 : index
      %34 = vector.load %arg7[%c0_23, %c0_24] : memref<256x128xbf16, #tpu.memory_space<vmem>>, vector<256x128xbf16>
      %cst_25 = arith.constant dense<0.000000e+00> : vector<16x128xf32>
      %35 = tpu.matmul %33, %34, %cst_25 {dimension_numbers = #tpu.dot_dimension_numbers<[1], [0], [0], [1], [0, 0, 1, 1], [], []>} : vector<16x256xbf16>, vector<256x128xbf16>, vector<16x128xf32> -> vector<16x128xf32>
      %36 = vector.extract_strided_slice %35 {offsets = [0, 0], sizes = [16, 1], strides = [1, 1]} : vector<16x128xf32> to vector<16x1xf32>
      %c0_26 = arith.constant 0 : index
      %c0_27 = arith.constant 0 : index
      %37 = vector.load %arg8[%c0_26, %c0_27] : memref<1x1xf32, #tpu.memory_space<vmem>>, vector<1x1xf32>
      %38 = vector.broadcast %37 : vector<1x1xf32> to vector<16x1xf32>
      %39 = arith.addf %36, %38 : vector<16x1xf32>
      %40 = arith.negf %39 : vector<16x1xf32>
      %41 = math.exp %40 : vector<16x1xf32>
      %cst_28 = arith.constant 1.000000e+00 : f32
      %42 = vector.broadcast %cst_28 : f32 to vector<16x1xf32>
      %43 = arith.addf %42, %41 : vector<16x1xf32>
      %44 = arith.divf %42, %43 : vector<16x1xf32>
      %c0_29 = arith.constant 0 : index
      %c0_30 = arith.constant 0 : index
      %45 = vector.load %arg9[%c0_29, %c0_30] : memref<16x1xf32, #tpu.memory_space<vmem>>, vector<16x1xf32>
      tpu.vector_store %arg9[%c0_29, %c0_30], %44 {strides = array<i32>} : memref<16x1xf32, #tpu.memory_space<vmem>>, vector<16x1xf32>,
    } else {
    }
    return
  }
  func.func @transform_0(%arg0: i32, %arg1: i32) -> (i32, i32) {
    %c0_i32 = arith.constant 0 : i32
    return %arg0, %arg1 : i32, i32
  }
  func.func @transform_1(%arg0: i32, %arg1: i32) -> (i32, i32) {
    %c0_i32 = arith.constant 0 : i32
    %c0_i32_0 = arith.constant 0 : i32
    return %arg1, %c0_i32 : i32, i32
  }
  func.func @transform_2(%arg0: i32, %arg1: i32) -> (i32, i32) {
    %c0_i32 = arith.constant 0 : i32
    %c0_i32_0 = arith.constant 0 : i32
    %c0_i32_1 = arith.constant 0 : i32
    return %c0_i32, %c0_i32_0 : i32, i32
  }
  func.func @transform_3(%arg0: i32, %arg1: i32) -> (i32, i32) {
    %c0_i32 = arith.constant 0 : i32
    %c0_i32_0 = arith.constant 0 : i32
    %c0_i32_1 = arith.constant 0 : i32
    return %c0_i32, %c0_i32_0 : i32, i32
  }
  func.func @transform_4(%arg0: i32, %arg1: i32) -> (i32, i32) {
    %c0_i32 = arith.constant 0 : i32
    %c0_i32_0 = arith.constant 0 : i32
    %c0_i32_1 = arith.constant 0 : i32
    return %c0_i32, %c0_i32_0 : i32, i32
  }
  func.func @transform_5(%arg0: i32, %arg1: i32) -> (i32, i32) {
    %c0_i32 = arith.constant 0 : i32
    %c0_i32_0 = arith.constant 0 : i32
    %c0_i32_1 = arith.constant 0 : i32
    return %c0_i32, %c0_i32_0 : i32, i32
  }
  func.func @transform_6(%arg0: i32, %arg1: i32) -> (i32, i32) {
    %c0_i32 = arith.constant 0 : i32
    %c0_i32_0 = arith.constant 0 : i32
    %c0_i32_1 = arith.constant 0 : i32
    return %c0_i32, %c0_i32_0 : i32, i32
  }
  func.func @transform_7(%arg0: i32, %arg1: i32) -> (i32, i32) {
    %c0_i32 = arith.constant 0 : i32
    %c0_i32_0 = arith.constant 0 : i32
    return %arg0, %c0_i32 : i32, i32
  }
}

</mosaic_0001>

<bundles_post_ra>
// kernel: tpu_custom_call.1
= control target key start
LH: loop header
LB: loop body
LE: loop exit
PB: predicated region body
PF: predicated region fallthrough
CT: control target
= control target key end

     0   :  { %s2029_s0 = inlined_call_operand.hbm [shape: f32[2,256], index: 0, kind: input, shape index: {}]   ;;  %s2030_s1 = inlined_call_operand.hbm [shape: bf16[256,512], index: 1, kind: input, shape index: {}]   ;;  %s2031_s2 = inlined_call_operand.vmem [shape: f32[1,512], index: 2, kind: input, shape index: {}]   ;;  %s2032_s3 = inlined_call_operand.hbm [shape: bf16[512,256], index: 3, kind: input, shape index: {}]   ;;  %s2033_s4 = inlined_call_operand.vmem [shape: f32[1,256], index: 4, kind: input, shape index: {}]   ;;  %s2034_s5 = inlined_call_operand.hbm [shape: bf16[256,128], index: 5, kind: input, shape index: {}]   ;;  %s2035_s6 = inlined_call_operand.<no memory space> [shape: f32[1,1], index: 6, kind: input, shape index: {}]   ;;  %s2036_s7 = inlined_call_operand.vmem [shape: f32[2,1], index: 7, kind: output, shape index: {}]  }
   0x1   :  { %v12_v0 = vstv %s2035_s6 }
   0x2   :  { %13 = vst [vmem:[#allocation3] sm:$0x1] %v12_v0 }
   0x3   :  { %14 = vsyncpa [#allocation5], 0 }
   0x4   :  { %15 = vsyncpa [#allocation7], 0 }
   0x5   :  { %16 = vsyncpa [#allocation10], 0 }
   0x6   :  { %21 = vsyncadd [#allocation5], 448  ;;  %s1940_s26 = smov [#allocation6]  }
   0x7   :  { %s34_s27 = sshll.u32 %s1940_s26, 4  ;;  %s35_s27 = int_to_ptr.vmem [resolvable:$true] %s34_s27 }
   0x8   :  { %s1862_s28 = scalar_lea.vmem %s35_s27, 8192  ;;  %p1867_p1 = scmp.lt.s32.totalorder %s35_s27, %s35_s27 }
   0x9   :  { %p1863_p0 = scmp.ne.s32.totalorder %s35_s27, %s1862_s28  ;;  %p1868_p2 = scmp.lt.s32.totalorder %s1862_s28, %s1862_s28 }
   0xb   :  { %p1869_p3 = por %p1868_p2, %p1867_p1 }
   0xd   :  { %p1870_p4 = pnand %p1869_p3, %p1863_p0 }
   0xf   :  { %1873 = shalt.err (!%p1870_p4)
}
  0x10   :  { %s1941_s29 = smov 256   ;;  %s1942_s30 = smov 16  }
  0x11   :  { %40 = dma.hbm_to_vmem [thread:$0]  %s2030_s1, 8192, %s35_s27, [#allocation7], %s1941_s29, %s1941_s29, %s1942_s30  }
  0x12   :  { %s1943_s6 = smov [#allocation4]  }
  0x13   :  { %s22_s10 = sshll.u32 %s1943_s6, 4  ;;  %s23_s10 = int_to_ptr.vmem [resolvable:$true] %s22_s10 }
  0x14   :  { %s1882_s11 = scalar_lea.vmem %s23_s10, 64  ;;  %s1886_s12 = scalar_lea.vmem %s23_s10, 512 }
  0x15   :  { %p1883_p5 = scmp.ne.s32.totalorder %s23_s10, %s1882_s11  ;;  %p1887_p6 = scmp.lt.s32.totalorder %s23_s10, %s23_s10 }
  0x16   :  { %p1888_p7 = scmp.lt.s32.totalorder %s1886_s12, %s1882_s11 }
  0x18   :  { %p1889_p8 = por %p1888_p7, %p1887_p6 }
  0x1a   :  { %p1890_p9 = pnand %p1889_p8, %p1883_p5 }
  0x1c   :  { %1893 = shalt.err (!%p1890_p9)
}
  0x1d   :  { %s1944_s13 = smov 64   ;;  %s1945_s14 = smov 4  }
  0x1e   :  { %28 = dma.hbm_to_vmem [thread:$0]  %s2029_s0, 64, %s23_s10, [#allocation5], %s1944_s13, %s1944_s13, %s1945_s14  }
  0x1f   :  { %s1946_s17 = smov [#allocation8]  }
  0x20   :  { %s48_s18 = sshll.u32 %s1946_s17, 4  ;;  %s49_s18 = int_to_ptr.vmem [resolvable:$true] %s48_s18 }
  0x21   :  { %s1902_s1 = scalar_lea.vmem %s49_s18, 8192  ;;  %p1907_p11 = scmp.lt.s32.totalorder %s49_s18, %s49_s18 }
  0x22   :  { %p1903_p10 = scmp.ne.s32.totalorder %s49_s18, %s1902_s1  ;;  %p1908_p12 = scmp.lt.s32.totalorder %s1902_s1, %s1902_s1 }
  0x24   :  { %p1909_p13 = por %p1908_p12, %p1907_p11 }
  0x26   :  { %p1910_p0 = pnand %p1909_p13, %p1903_p10 }
  0x28   :  { %1913 = shalt.err (!%p1910_p0)
}
  0x29   :  { %s1947_s19 = smov 128   ;;  %s1948_s20 = smov 8  }
  0x2a   :  { %54 = dma.hbm_to_vmem [thread:$0]  %s2032_s3, 8192, %s49_s18, [#allocation7], %s1947_s19, %s1947_s19, %s1948_s20  }
  0x2b   :  { %s1949_s23 = smov [#allocation9]  }
  0x2c   :  { %s62_s24 = sshll.u32 %s1949_s23, 4  ;;  %s63_s24 = int_to_ptr.vmem [resolvable:$true] %s62_s24 }
  0x2d   :  { %s1922_s0 = scalar_lea.vmem %s63_s24, 2048  ;;  %p1927_p2 = scmp.lt.s32.totalorder %s63_s24, %s63_s24 }
  0x2e   :  { %p1923_p1 = scmp.ne.s32.totalorder %s63_s24, %s1922_s0  ;;  %p1928_p3 = scmp.lt.s32.totalorder %s1922_s0, %s1922_s0 }
  0x30   :  { %p1929_p4 = por %p1928_p3, %p1927_p2 }
  0x32   :  { %p1930_p5 = pnand %p1929_p4, %p1923_p1 }
  0x34   :  { %1933 = shalt.err (!%p1930_p5)
}
  0x35   :  { %68 = dma.hbm_to_vmem [thread:$0]  %s2034_s5, 2048, %s63_s24, [#allocation10], %s1944_s13, %s1944_s13, %s1945_s14  }
  0x36   :  { %1934 = dma.done.wait [#allocation5], 512  }
  0x37   :  { %1935 = vsyncadd [#allocation5], 4294966784 }
  0x38   :  { %1936 = dma.done.wait [#allocation7], 16384  }
  0x39   :  { %1937 = vsyncadd [#allocation7], 4294950912 }
  0x3a   :  { %1938 = dma.done.wait [#allocation10], 2048  }
  0x3b   :  { %1939 = vsyncadd [#allocation10], 4294965248  ;;  %v1630_v1 = vld [vmem:[#allocation6 + $0xe4] ss:$16 sps:$4 sm:$0xff]   ;;  %v1632_v2 = vld [vmem:[#allocation6 + $0xec] ss:$16 sps:$4 sm:$0xff]   ;;  %v117_v40 = vlaneseq }
  0x3c   :  { %546 = vmatprep.subr.bf16.mxu0 %v1630_v1  ;;  %v1634_v3 = vld [vmem:[#allocation6 + $0xe0] ss:$16 sps:$4 sm:$0xff]   ;;  %v1635_v4 = vld [vmem:[#allocation6 + $0xe8] ss:$16 sps:$4 sm:$0xff]   ;;  %589 = vmatprep.subr.bf16.mxu1 %v1632_v2  ;;  %v1636_v5 = vld [vmem:[#allocation6 + $0xc4] ss:$16 sps:$4 sm:$0xff]  }
  0x3d   :  { %547 = vmatpush1.bf16.msra.mxu0 %v1634_v3  ;;  %590 = vmatpush1.bf16.msra.mxu1 %v1635_v4  ;;  %v1638_v6 = vld [vmem:[#allocation6 + $0xcc] ss:$16 sps:$4 sm:$0xff]   ;;  %v1640_v7 = vld [vmem:[#allocation6 + $0xc0] ss:$16 sps:$4 sm:$0xff]   ;;  %v1641_v8 = vld [vmem:[#allocation6 + $0xc8] ss:$16 sps:$4 sm:$0xff]  }
  0x3e   :  { %548 = vmatprep.subr.bf16.mxu0 %v1636_v5  ;;  %591 = vmatprep.subr.bf16.mxu1 %v1638_v6  ;;  %v1642_v9 = vld [vmem:[#allocation6 + $0xa4] ss:$16 sps:$4 sm:$0xff]   ;;  %v1644_v10 = vld [vmem:[#allocation6 + $0xac] ss:$16 sps:$4 sm:$0xff]   ;;  %v1646_v11 = vld [vmem:[#allocation6 + $0xa0] ss:$16 sps:$4 sm:$0xff]  }
  0x3f   :  { %v1647_v12 = vld [vmem:[#allocation6 + $0xa8] ss:$16 sps:$4 sm:$0xff]   ;;  %v1648_v13 = vld [vmem:[#allocation6 + $0x84] ss:$16 sps:$4 sm:$0xff]   ;;  %v1650_v14 = vld [vmem:[#allocation6 + $0x8c] ss:$16 sps:$4 sm:$0xff]  }
  0x40   :  { %v1652_v15 = vld [vmem:[#allocation6 + $0x80] ss:$16 sps:$4 sm:$0xff]   ;;  %v1653_v16 = vld [vmem:[#allocation6 + $0x88] ss:$16 sps:$4 sm:$0xff]   ;;  %v1654_v17 = vld [vmem:[#allocation6 + $0x64] ss:$16 sps:$4 sm:$0xff]  }
  0x41   :  { %549 = vmatpush1.bf16.msra.mxu0 %v1640_v7  ;;  %592 = vmatpush1.bf16.msra.mxu1 %v1641_v8  ;;  %v1656_v18 = vld [vmem:[#allocation6 + $0x6c] ss:$16 sps:$4 sm:$0xff]   ;;  %v1658_v19 = vld [vmem:[#allocation6 + $0x60] ss:$16 sps:$4 sm:$0xff]   ;;  %v1659_v20 = vld [vmem:[#allocation6 + $0x68] ss:$16 sps:$4 sm:$0xff]  }
  0x42   :  { %550 = vmatprep.subr.bf16.mxu0 %v1642_v9  ;;  %593 = vmatprep.subr.bf16.mxu1 %v1644_v10  ;;  %v1660_v21 = vld [vmem:[#allocation6 + $0x44] ss:$16 sps:$4 sm:$0xff]   ;;  %v1662_v22 = vld [vmem:[#allocation6 + $0x4c] ss:$16 sps:$4 sm:$0xff]   ;;  %v1664_v23 = vld [vmem:[#allocation6 + $0x40] ss:$16 sps:$4 sm:$0xff]  }
  0x43   :  { %v1665_v24 = vld [vmem:[#allocation6 + $0x48] ss:$16 sps:$4 sm:$0xff]   ;;  %v1666_v25 = vld [vmem:[#allocation6 + $0x24] ss:$16 sps:$4 sm:$0xff]   ;;  %v1668_v26 = vld [vmem:[#allocation6 + $0x2c] ss:$16 sps:$4 sm:$0xff]  }
  0x44   :  { %v1670_v27 = vld [vmem:[#allocation6 + $0x20] ss:$16 sps:$4 sm:$0xff]   ;;  %v1671_v28 = vld [vmem:[#allocation6 + $0x28] ss:$16 sps:$4 sm:$0xff]   ;;  %v1672_v29 = vld [vmem:[#allocation6 + $0x4] ss:$16 sps:$4 sm:$0xff]  }
  0x45   :  { %551 = vmatpush1.bf16.msra.mxu0 %v1646_v11  ;;  %594 = vmatpush1.bf16.msra.mxu1 %v1647_v12  ;;  %v1674_v30 = vld [vmem:[#allocation6 + $0xc] ss:$16 sps:$4 sm:$0xff]   ;;  %v1676_v31 = vld [vmem:[#allocation6] ss:$16 sps:$4 sm:$0xff]   ;;  %v1677_v32 = vld [vmem:[#allocation6 + $0x8] ss:$16 sps:$4 sm:$0xff]  }
  0x46   :  { %552 = vmatprep.subr.bf16.mxu0 %v1648_v13  ;;  %595 = vmatprep.subr.bf16.mxu1 %v1650_v14  ;;  %v1678_v33 = vld [vmem:[#allocation6 + $0x1e4] ss:$16 sps:$4 sm:$0xff]   ;;  %v1680_v34 = vld [vmem:[#allocation6 + $0x1ec] ss:$16 sps:$4 sm:$0xff]   ;;  %v1682_v35 = vld [vmem:[#allocation6 + $0x1e0] ss:$16 sps:$4 sm:$0xff]  }
  0x47   :  { %v1683_v36 = vld [vmem:[#allocation6 + $0x1e8] ss:$16 sps:$4 sm:$0xff]   ;;  %v1684_v37 = vld [vmem:[#allocation6 + $0x1c4] ss:$16 sps:$4 sm:$0xff]   ;;  %v1686_v38 = vld [vmem:[#allocation6 + $0x1cc] ss:$16 sps:$4 sm:$0xff]  }
  0x48   :  { %v1688_v39 = vld [vmem:[#allocation6 + $0x1c0] ss:$16 sps:$4 sm:$0xff]   ;;  %v1689_v41 = vld [vmem:[#allocation6 + $0x1c8] ss:$16 sps:$4 sm:$0xff]   ;;  %v1690_v42 = vld [vmem:[#allocation6 + $0x1a4] ss:$16 sps:$4 sm:$0xff]  }
  0x49   :  { %553 = vmatpush1.bf16.msra.mxu0 %v1652_v15  ;;  %596 = vmatpush1.bf16.msra.mxu1 %v1653_v16  ;;  %v1692_v43 = vld [vmem:[#allocation6 + $0x1ac] ss:$16 sps:$4 sm:$0xff]   ;;  %v1694_v44 = vld [vmem:[#allocation6 + $0x1a0] ss:$16 sps:$4 sm:$0xff]   ;;  %v1695_v45 = vld [vmem:[#allocation6 + $0x1a8] ss:$16 sps:$4 sm:$0xff]  }
  0x4a   :  { %554 = vmatprep.subr.bf16.mxu0 %v1654_v17  ;;  %597 = vmatprep.subr.bf16.mxu1 %v1656_v18  ;;  %v2005_v46 = vshrl.u32 %v117_v40, 7  ;;  %v1696_v47 = vld [vmem:[#allocation6 + $0x184] ss:$16 sps:$4 sm:$0xff]   ;;  %v1698_v48 = vld [vmem:[#allocation6 + $0x18c] ss:$16 sps:$4 sm:$0xff]   ;;  %vm1403_vm12 = vcmask 7168  }
  0x4b   :  { %v1700_v49 = vld [vmem:[#allocation6 + $0x180] ss:$16 sps:$4 sm:$0xff]   ;;  %v1701_v50 = vld [vmem:[#allocation6 + $0x188] ss:$16 sps:$4 sm:$0xff]   ;;  %v1702_v51 = vld [vmem:[#allocation6 + $0x164] ss:$16 sps:$4 sm:$0xff]  }
  0x4c   :  { %v1704_v52 = vld [vmem:[#allocation6 + $0x16c] ss:$16 sps:$4 sm:$0xff]   ;;  %v1850_v53 = vld.sshfl [vmem:[#allocation4] sm:$0xff pattern:$0x76325410] }
  0x4d   :  { %555 = vmatpush1.bf16.msra.mxu0 %v1658_v19  ;;  %598 = vmatpush1.bf16.msra.mxu1 %v1659_v20  ;;  %v1851_v54 = vld.sshfl [vmem:[#allocation4 + $0x8] sm:$0xff pattern:$0x76325410]  ;;  %v1852_v55 = vld.sshfl [vmem:[#allocation4 + $0x10] sm:$0xff pattern:$0x76325410] }
  0x4e   :  { %556 = vmatprep.subr.bf16.mxu0 %v1660_v21  ;;  %599 = vmatprep.subr.bf16.mxu1 %v1662_v22  ;;  %v1853_v56 = vld.sshfl [vmem:[#allocation4 + $0x18] sm:$0xff pattern:$0x76325410]  ;;  %v1706_v57 = vld [vmem:[#allocation6 + $0x160] ss:$16 sps:$4 sm:$0xff]   ;;  %v129_v61 = vcombine.high %v1850_v53, %v1851_v54  ;;  %v128_v10 = vcombine.low %v1850_v53, %v1851_v54 }
  0x4f   :  { %v1707_v58 = vld [vmem:[#allocation6 + $0x168] ss:$16 sps:$4 sm:$0xff]   ;;  %v1708_v59 = vld [vmem:[#allocation6 + $0x144] ss:$16 sps:$4 sm:$0xff]   ;;  %v1710_v60 = vld [vmem:[#allocation6 + $0x14c] ss:$16 sps:$4 sm:$0xff]   ;;  %v147_v62 = vcombine.high %v1852_v55, %v1853_v56  ;;  %v146_v11 = vcombine.low %v1852_v55, %v1853_v56 }
  0x50   :  { %v1712_v63 = vld [vmem:[#allocation6 + $0x140] ss:$16 sps:$4 sm:$0xff]   ;;  %v1713_v0 = vld [vmem:[#allocation6 + $0x148] ss:$16 sps:$4 sm:$0xff]   ;;  %v1714_v1 = vld [vmem:[#allocation6 + $0x124] ss:$16 sps:$4 sm:$0xff]  }
  0x51   :  { %557 = vmatpush1.bf16.msra.mxu0 %v1664_v23  ;;  %600 = vmatpush1.bf16.msra.mxu1 %v1665_v24  ;;  %v153_v2 = vpack.c.bf16 %v147_v62, %v129_v61  ;;  %v1716_v3 = vld [vmem:[#allocation6 + $0x12c] ss:$16 sps:$4 sm:$0xff]   ;;  %v1718_v4 = vld [vmem:[#allocation6 + $0x120] ss:$16 sps:$4 sm:$0xff]   ;;  %v1719_v5 = vld [vmem:[#allocation6 + $0x128] ss:$16 sps:$4 sm:$0xff]   ;;  %v152_v14 = vpack.c.bf16 %v146_v11, %v128_v10 }
  0x52   :  { %558 = vmatprep.subr.bf16.mxu0 %v1666_v25  ;;  %601 = vmatprep.subr.bf16.mxu1 %v1668_v26  ;;  %v1720_v6 = vld [vmem:[#allocation6 + $0x104] ss:$16 sps:$4 sm:$0xff]   ;;  %v1722_v7 = vld [vmem:[#allocation6 + $0x10c] ss:$16 sps:$4 sm:$0xff]   ;;  %v1724_v8 = vld [vmem:[#allocation6 + $0x100] ss:$16 sps:$4 sm:$0xff]  }
  0x53   :  { %578 = vmatprep.mubr.bf16.mxu0 %v153_v2  ;;  %621 = vmatprep.mubr.bf16.mxu1 %v153_v2  ;;  %v1725_v9 = vld [vmem:[#allocation6 + $0x108] ss:$16 sps:$4 sm:$0xff]   ;;  %v1732_v12 = vld [vmem:[#allocation8 + $0x74] ss:$8 sps:$4 sm:$0xff]   ;;  %v1738_v17 = vld [vmem:[#allocation8 + $0x64] ss:$8 sps:$4 sm:$0xff]  }
  0x54   :  { %v1735_v13 = vld [vmem:[#allocation8 + $0x174] ss:$8 sps:$4 sm:$0xff]   ;;  %v1730_v15 = vld [vmem:[#allocation8 + $0x70] ss:$8 sps:$4 sm:$0xff]   ;;  %v1741_v18 = vld [vmem:[#allocation8 + $0x164] ss:$8 sps:$4 sm:$0xff]  }
  0x55   :  { %559 = vmatpush1.bf16.msra.mxu0 %v1670_v27  ;;  %602 = vmatpush1.bf16.msra.mxu1 %v1671_v28  ;;  %v1733_v16 = vld [vmem:[#allocation8 + $0x170] ss:$8 sps:$4 sm:$0xff]   ;;  %v1736_v19 = vld [vmem:[#allocation8 + $0x60] ss:$8 sps:$4 sm:$0xff]   ;;  %v1744_v21 = vld [vmem:[#allocation8 + $0x54] ss:$8 sps:$4 sm:$0xff]  }
  0x56   :  { %560 = vmatprep.subr.bf16.mxu0 %v1672_v29  ;;  %603 = vmatprep.subr.bf16.mxu1 %v1674_v30  ;;  %v1739_v20 = vld [vmem:[#allocation8 + $0x160] ss:$8 sps:$4 sm:$0xff]   ;;  %v1747_v22 = vld [vmem:[#allocation8 + $0x154] ss:$8 sps:$4 sm:$0xff]   ;;  %v1742_v23 = vld [vmem:[#allocation8 + $0x50] ss:$8 sps:$4 sm:$0xff]  }
  0x57   :  { %v1745_v24 = vld [vmem:[#allocation8 + $0x150] ss:$8 sps:$4 sm:$0xff]   ;;  %v1750_v25 = vld [vmem:[#allocation8 + $0x44] ss:$8 sps:$4 sm:$0xff]   ;;  %v1748_v27 = vld [vmem:[#allocation8 + $0x40] ss:$8 sps:$4 sm:$0xff]  }
  0x58   :  { %v1753_v26 = vld [vmem:[#allocation8 + $0x144] ss:$8 sps:$4 sm:$0xff]   ;;  %v1751_v28 = vld [vmem:[#allocation8 + $0x140] ss:$8 sps:$4 sm:$0xff]   ;;  %v1756_v29 = vld [vmem:[#allocation8 + $0x34] ss:$8 sps:$4 sm:$0xff]  }
  0x59   :  { %561 = vmatpush1.bf16.msra.mxu0 %v1676_v31  ;;  %604 = vmatpush1.bf16.msra.mxu1 %v1677_v32  ;;  %v1759_v30 = vld [vmem:[#allocation8 + $0x134] ss:$8 sps:$4 sm:$0xff]   ;;  %v1754_v31 = vld [vmem:[#allocation8 + $0x30] ss:$8 sps:$4 sm:$0xff]   ;;  %v1787_v53 = vld [vmem:[#allocation8 + $0x1e0] ss:$8 sps:$4 sm:$0xff]  }
  0x5a   :  { %562 = vmatprep.subr.bf16.mxu0 %v1678_v33  ;;  %605 = vmatprep.subr.bf16.mxu1 %v1680_v34  ;;  %v1757_v32 = vld [vmem:[#allocation8 + $0x130] ss:$8 sps:$4 sm:$0xff]   ;;  %v1762_v33 = vld [vmem:[#allocation8 + $0x24] ss:$8 sps:$4 sm:$0xff]   ;;  %v1792_v54 = vld [vmem:[#allocation8 + $0xd4] ss:$8 sps:$4 sm:$0xff]  }
  0x5b   :  { %v1765_v34 = vld [vmem:[#allocation8 + $0x124] ss:$8 sps:$4 sm:$0xff]   ;;  %v1769_v40 = vld [vmem:[#allocation8 + $0x110] ss:$8 sps:$4 sm:$0xff]   ;;  %v1795_v55 = vld [vmem:[#allocation8 + $0x1d4] ss:$8 sps:$4 sm:$0xff]  }
  0x5c   :  { %v1790_v56 = vld [vmem:[#allocation8 + $0xd0] ss:$8 sps:$4 sm:$0xff]   ;;  %v1799_v61 = vld [vmem:[#allocation8 + $0x1c0] ss:$8 sps:$4 sm:$0xff]   ;;  %v1804_v62 = vld [vmem:[#allocation8 + $0xb4] ss:$8 sps:$4 sm:$0xff]  }
  0x5d   :  { %563 = vmatpush2.bf16.msra.mxu0 %v1682_v35  ;;  %606 = vmatpush2.bf16.msra.mxu1 %v1683_v36  ;;  %v1760_v35 = vld [vmem:[#allocation8 + $0x20] ss:$8 sps:$4 sm:$0xff]   ;;  %v1810_v2 = vld [vmem:[#allocation8 + $0xa4] ss:$8 sps:$4 sm:$0xff]  }
  0x5e   :  { %564 = vmatprep.subr.bf16.mxu0 %v1684_v37  ;;  %607 = vmatprep.subr.bf16.mxu1 %v1686_v38  ;;  %v1763_v36 = vld [vmem:[#allocation8 + $0x120] ss:$8 sps:$4 sm:$0xff]   ;;  %v1768_v37 = vld [vmem:[#allocation8 + $0x14] ss:$8 sps:$4 sm:$0xff]   ;;  %v1822_v11 = vld [vmem:[#allocation8 + $0x84] ss:$8 sps:$4 sm:$0xff]  }
  0x5f   :  { %v1771_v38 = vld [vmem:[#allocation8 + $0x114] ss:$8 sps:$4 sm:$0xff]   ;;  %v1820_v10 = vld [vmem:[#allocation8 + $0x80] ss:$8 sps:$4 sm:$0xff]  }
  0x61   :  { %565 = vmatpush2.bf16.msra.mxu0 %v1688_v39  ;;  %608 = vmatpush2.bf16.msra.mxu1 %v1689_v41  ;;  %v1766_v39 = vld [vmem:[#allocation8 + $0x10] ss:$8 sps:$4 sm:$0xff]   ;;  %v1774_v41 = vld [vmem:[#allocation8 + $0x4] ss:$8 sps:$4 sm:$0xff]  }
  0x62   :  { %566 = vmatprep.subr.bf16.mxu0 %v1690_v42  ;;  %609 = vmatprep.subr.bf16.mxu1 %v1692_v43  ;;  %v1777_v42 = vld [vmem:[#allocation8 + $0x104] ss:$8 sps:$4 sm:$0xff]   ;;  %v1772_v43 = vld [vmem:[#allocation8] ss:$8 sps:$4 sm:$0xff]  }
  0x65   :  { %567 = vmatpush2.bf16.msra.mxu0 %v1694_v44  ;;  %610 = vmatpush2.bf16.msra.mxu1 %v1695_v45  ;;  %v1775_v44 = vld [vmem:[#allocation8 + $0x100] ss:$8 sps:$4 sm:$0xff]   ;;  %v1780_v45 = vld [vmem:[#allocation8 + $0xf4] ss:$8 sps:$4 sm:$0xff]  }
  0x66   :  { %568 = vmatprep.subr.bf16.mxu0 %v1696_v47  ;;  %611 = vmatprep.subr.bf16.mxu1 %v1698_v48  ;;  %v1783_v47 = vld [vmem:[#allocation8 + $0x1f4] ss:$8 sps:$4 sm:$0xff]   ;;  %v1778_v48 = vld [vmem:[#allocation8 + $0xf0] ss:$8 sps:$4 sm:$0xff]  }
  0x69   :  { %569 = vmatpush2.bf16.msra.mxu0 %v1700_v49  ;;  %612 = vmatpush2.bf16.msra.mxu1 %v1701_v50  ;;  %v1781_v49 = vld [vmem:[#allocation8 + $0x1f0] ss:$8 sps:$4 sm:$0xff]   ;;  %v1786_v50 = vld [vmem:[#allocation8 + $0xe4] ss:$8 sps:$4 sm:$0xff]  }
  0x6a   :  { %570 = vmatprep.subr.bf16.mxu0 %v1702_v51  ;;  %613 = vmatprep.subr.bf16.mxu1 %v1704_v52  ;;  %v1789_v51 = vld [vmem:[#allocation8 + $0x1e4] ss:$8 sps:$4 sm:$0xff]   ;;  %v1784_v52 = vld [vmem:[#allocation8 + $0xe0] ss:$8 sps:$4 sm:$0xff]  }
  0x6d   :  { %571 = vmatpush2.bf16.msra.mxu0 %v1706_v57  ;;  %614 = vmatpush2.bf16.msra.mxu1 %v1707_v58  ;;  %v1793_v57 = vld [vmem:[#allocation8 + $0x1d0] ss:$8 sps:$4 sm:$0xff]   ;;  %v1798_v58 = vld [vmem:[#allocation8 + $0xc4] ss:$8 sps:$4 sm:$0xff]  }
  0x6e   :  { %572 = vmatprep.subr.bf16.mxu0 %v1708_v59  ;;  %615 = vmatprep.subr.bf16.mxu1 %v1710_v60  ;;  %v1801_v59 = vld [vmem:[#allocation8 + $0x1c4] ss:$8 sps:$4 sm:$0xff]   ;;  %v1796_v60 = vld [vmem:[#allocation8 + $0xc0] ss:$8 sps:$4 sm:$0xff]  }
  0x71   :  { %573 = vmatpush2.bf16.msra.mxu0 %v1712_v63  ;;  %616 = vmatpush2.bf16.msra.mxu1 %v1713_v0  ;;  %v1807_v63 = vld [vmem:[#allocation8 + $0x1b4] ss:$8 sps:$4 sm:$0xff]   ;;  %v1802_v0 = vld [vmem:[#allocation8 + $0xb0] ss:$8 sps:$4 sm:$0xff]  }
  0x72   :  { %574 = vmatprep.subr.bf16.mxu0 %v1714_v1  ;;  %617 = vmatprep.subr.bf16.mxu1 %v1716_v3  ;;  %v1805_v1 = vld [vmem:[#allocation8 + $0x1b0] ss:$8 sps:$4 sm:$0xff]   ;;  %v1813_v3 = vld [vmem:[#allocation8 + $0x1a4] ss:$8 sps:$4 sm:$0xff]  }
  0x75   :  { %575 = vmatpush2.bf16.msra.mxu0 %v1718_v4  ;;  %618 = vmatpush2.bf16.msra.mxu1 %v1719_v5  ;;  %v1808_v4 = vld [vmem:[#allocation8 + $0xa0] ss:$8 sps:$4 sm:$0xff]  }
  0x76   :  { %576 = vmatprep.subr.bf16.mxu0 %v1720_v6  ;;  %619 = vmatprep.subr.bf16.mxu1 %v1722_v7  ;;  %v1811_v5 = vld [vmem:[#allocation8 + $0x1a0] ss:$8 sps:$4 sm:$0xff]   ;;  %v1816_v6 = vld [vmem:[#allocation8 + $0x94] ss:$8 sps:$4 sm:$0xff]  }
  0x77   :  { %v1819_v7 = vld [vmem:[#allocation8 + $0x194] ss:$8 sps:$4 sm:$0xff]  }
  0x79   :  { %577 = vmatpush2.bf16.msra.mxu0 %v1724_v8  ;;  %620 = vmatpush2.bf16.msra.mxu1 %v1725_v9  ;;  %v1814_v8 = vld [vmem:[#allocation8 + $0x90] ss:$8 sps:$4 sm:$0xff]  }
  0x7a   :  { %1113 = vmatprep.subr.bf16.mxu0 %v1732_v12  ;;  %1156 = vmatprep.subr.bf16.mxu1 %v1735_v13  ;;  %v1817_v9 = vld [vmem:[#allocation8 + $0x190] ss:$8 sps:$4 sm:$0xff]   ;;  %v1823_v12 = vld [vmem:[#allocation8 + $0x180] ss:$8 sps:$4 sm:$0xff]   ;;  %v1825_v13 = vld [vmem:[#allocation8 + $0x184] ss:$8 sps:$4 sm:$0xff]  }
  0x7c   :  { %579 = vmatmul.mubr.bf16.vlgmr.msra.gmra.mxu0 %v152_v14  ;;  %622 = vmatmul.mubr.bf16.vlgmr.msra.gmra.mxu1 %v152_v14  ;;  %v1826_v14 = vld [vmem:[#allocation9 + $0x78] sm:$0xff]  }
  0x7d   :  { %1114 = vmatpush1.bf16.msra.mxu0 %v1730_v15  ;;  %1157 = vmatpush1.bf16.msra.mxu1 %v1733_v16  ;;  %v663_v15 = vsub.s32 0, %v2005_v46  ;;  %v659_v16 = vld [vmem:[%s2031_s2] sm:$0xf] }
  0x7e   :  { %1115 = vmatprep.subr.bf16.mxu0 %v1738_v17  ;;  %1158 = vmatprep.subr.bf16.mxu1 %v1741_v18  ;;  %v667_v17 = vsub.s32 1, %v2005_v46  ;;  %v675_v18 = vsub.s32 3, %v2005_v46 }
  0x81   :  { %1116 = vmatpush1.bf16.msra.mxu0 %v1736_v19  ;;  %1159 = vmatpush1.bf16.msra.mxu1 %v1739_v20  ;;  %v671_v19 = vsub.s32 2, %v2005_v46  ;;  %v664_v20 = vrot.slane %v659_v16, %v663_v15 }
  0x82   :  { %1117 = vmatprep.subr.bf16.mxu0 %v1744_v21  ;;  %1160 = vmatprep.subr.bf16.mxu1 %v1747_v22 }
  0x85   :  { %1118 = vmatpush1.bf16.msra.mxu0 %v1742_v23  ;;  %1161 = vmatpush1.bf16.msra.mxu1 %v1745_v24  ;;  %v668_v23 = vrot.slane %v659_v16, %v667_v17  ;;  %v676_v24 = vrot.slane %v659_v16, %v675_v18 }
  0x86   :  { %1119 = vmatprep.subr.bf16.mxu0 %v1750_v25  ;;  %1162 = vmatprep.subr.bf16.mxu1 %v1753_v26  ;;  %v672_v25 = vrot.slane %v659_v16, %v671_v19 }
  0x89   :  { %1120 = vmatpush1.bf16.msra.mxu0 %v1748_v27  ;;  %1163 = vmatpush1.bf16.msra.mxu1 %v1751_v28 }
  0x8a   :  { %1121 = vmatprep.subr.bf16.mxu0 %v1756_v29  ;;  %1164 = vmatprep.subr.bf16.mxu1 %v1759_v30 }
  0x8d   :  { %1122 = vmatpush1.bf16.msra.mxu0 %v1754_v31  ;;  %1165 = vmatpush1.bf16.msra.mxu1 %v1757_v32 }
  0x8e   :  { %1123 = vmatprep.subr.bf16.mxu0 %v1762_v33  ;;  %1166 = vmatprep.subr.bf16.mxu1 %v1765_v34 }
  0x91   :  { %1124 = vmatpush1.bf16.msra.mxu0 %v1760_v35  ;;  %1167 = vmatpush1.bf16.msra.mxu1 %v1763_v36 }
  0x92   :  { %1125 = vmatprep.subr.bf16.mxu0 %v1768_v37  ;;  %1168 = vmatprep.subr.bf16.mxu1 %v1771_v38 }
  0x95   :  { %1126 = vmatpush1.bf16.msra.mxu0 %v1766_v39  ;;  %1169 = vmatpush1.bf16.msra.mxu1 %v1769_v40 }
  0x96   :  { %1127 = vmatprep.subr.bf16.mxu0 %v1774_v41  ;;  %1170 = vmatprep.subr.bf16.mxu1 %v1777_v42 }
  0x99   :  { %1128 = vmatpush1.bf16.msra.mxu0 %v1772_v43  ;;  %1171 = vmatpush1.bf16.msra.mxu1 %v1775_v44 }
  0x9a   :  { %1129 = vmatprep.subr.bf16.mxu0 %v1780_v45  ;;  %1172 = vmatprep.subr.bf16.mxu1 %v1783_v47 }
  0x9d   :  { %1130 = vmatpush2.bf16.msra.mxu0 %v1778_v48  ;;  %1173 = vmatpush2.bf16.msra.mxu1 %v1781_v49 }
  0x9e   :  { %1131 = vmatprep.subr.bf16.mxu0 %v1786_v50  ;;  %1174 = vmatprep.subr.bf16.mxu1 %v1789_v51 }
  0xa1   :  { %1132 = vmatpush2.bf16.msra.mxu0 %v1784_v52  ;;  %1175 = vmatpush2.bf16.msra.mxu1 %v1787_v53 }
  0xa2   :  { %1133 = vmatprep.subr.bf16.mxu0 %v1792_v54  ;;  %1176 = vmatprep.subr.bf16.mxu1 %v1795_v55 }
  0xa5   :  { %1134 = vmatpush2.bf16.msra.mxu0 %v1790_v56  ;;  %1177 = vmatpush2.bf16.msra.mxu1 %v1793_v57  ;;  %v1827_v57 = vld [vmem:[#allocation9 + $0x38] sm:$0xff]  }
  0xa6   :  { %1135 = vmatprep.subr.bf16.mxu0 %v1798_v58  ;;  %1178 = vmatprep.subr.bf16.mxu1 %v1801_v59 }
  0xa9   :  { %1136 = vmatpush2.bf16.msra.mxu0 %v1796_v60  ;;  %1179 = vmatpush2.bf16.msra.mxu1 %v1799_v61  ;;  %v1828_v61 = vld [vmem:[#allocation9 + $0x70] sm:$0xff]  }
  0xaa   :  { %1137 = vmatprep.subr.bf16.mxu0 %v1804_v62  ;;  %1180 = vmatprep.subr.bf16.mxu1 %v1807_v63  ;;  %v1829_v63 = vld [vmem:[#allocation9 + $0x30] sm:$0xff]  }
  0xad   :  { %1138 = vmatpush2.bf16.msra.mxu0 %v1802_v0  ;;  %1181 = vmatpush2.bf16.msra.mxu1 %v1805_v1  ;;  %v1830_v0 = vld [vmem:[#allocation9 + $0x68] sm:$0xff]  }
  0xae   :  { %1139 = vmatprep.subr.bf16.mxu0 %v1810_v2  ;;  %1182 = vmatprep.subr.bf16.mxu1 %v1813_v3  ;;  %v1831_v1 = vld [vmem:[#allocation9 + $0x28] sm:$0xff]   ;;  %v1832_v2 = vld [vmem:[#allocation9 + $0x60] sm:$0xff]  }
  0xaf   :  { %v1833_v3 = vld [vmem:[#allocation9 + $0x20] sm:$0xff]  }
  0xb1   :  { %1140 = vmatpush2.bf16.msra.mxu0 %v1808_v4  ;;  %1183 = vmatpush2.bf16.msra.mxu1 %v1811_v5  ;;  %v1834_v4 = vld [vmem:[#allocation9 + $0x58] sm:$0xff]  }
  0xb2   :  { %1141 = vmatprep.subr.bf16.mxu0 %v1816_v6  ;;  %1184 = vmatprep.subr.bf16.mxu1 %v1819_v7  ;;  %v1835_v5 = vld [vmem:[#allocation9 + $0x18] sm:$0xff]   ;;  %v1836_v6 = vld [vmem:[#allocation9 + $0x50] sm:$0xff]  }
  0xb3   :  { %v1837_v7 = vld [vmem:[#allocation9 + $0x10] sm:$0xff]  }
  0xb5   :  { %1142 = vmatpush2.bf16.msra.mxu0 %v1814_v8  ;;  %1185 = vmatpush2.bf16.msra.mxu1 %v1817_v9  ;;  %v1838_v8 = vld [vmem:[#allocation9 + $0x48] sm:$0xff]  }
  0xb6   :  { %1143 = vmatprep.subr.bf16.mxu0 %v1822_v11  ;;  %1186 = vmatprep.subr.bf16.mxu1 %v1825_v13  ;;  %v1839_v9 = vld [vmem:[#allocation9 + $0x8] sm:$0xff]   ;;  %v1841_v11 = vld [vmem:[#allocation9] sm:$0xff]  }
  0xb9   :  { %1144 = vmatpush2.bf16.msra.mxu0 %v1820_v10  ;;  %1187 = vmatpush2.bf16.msra.mxu1 %v1823_v12  ;;  %v1840_v10 = vld [vmem:[#allocation9 + $0x40] sm:$0xff]  }
  0xba   :  { %1597 = vmatprep.subr.bf16.mxu0 %v1826_v14  ;;  %v781_v12 = vld [vmem:[%s2033_s4] sm:$0x3] }
  0xbb   :  { %v786_v13 = vrot.slane %v781_v12, %v663_v15  ;;  %v790_v14 = vrot.slane %v781_v12, %v667_v17 }
 0x13c   :  { %v580_v21 = vpop.f32.mrf.mxu0  ;;  %v623_v22 = vpop.f32.mrf.mxu1 }
 0x13d   :  { %v681_v28 = vadd.f32 %v664_v20, %v580_v21  ;;  %v683_v35 = vadd.f32 %v672_v25, %v623_v22 }
 0x13e   :  { %v582_v26 = vpop.f32.mrf.mxu0  ;;  %v625_v27 = vpop.f32.mrf.mxu1 }
 0x13f   :  { %v682_v29 = vadd.f32 %v668_v23, %v582_v26  ;;  %v684_v32 = vadd.f32 %v676_v24, %v625_v27  ;;  %vm689_vm0 = vcmp.gt.f32.partialorder %v681_v28, 0.0  ;;  %v697_v43 = vmul.f32 0.2, %v681_v28 }
 0x140   :  { %v584_v30 = vpop.f32.mrf.mxu0  ;;  %v627_v31 = vpop.f32.mrf.mxu1  ;;  %v699_v45 = vmul.f32 0.2, %v683_v35  ;;  %vm691_vm6 = vcmp.gt.f32.partialorder %v683_v35, 0.0 }
 0x141   :  { %v685_v33 = vadd.f32 %v664_v20, %v584_v30  ;;  %v687_v34 = vadd.f32 %v672_v25, %v627_v31  ;;  %v698_v38 = vmul.f32 0.2, %v682_v29  ;;  %vm690_vm2 = vcmp.gt.f32.partialorder %v682_v29, 0.0 }
 0x142   :  { %v586_v36 = vpop.f32.mrf.mxu0  ;;  %v629_v37 = vpop.f32.mrf.mxu1  ;;  %v700_v44 = vmul.f32 0.2, %v684_v32  ;;  %vm692_vm4 = vcmp.gt.f32.partialorder %v684_v32, 0.0  ;;  %v705_v53 = vsel %vm689_vm0, %v681_v28, %v697_v43  ;;  %v707_v58 = vsel %vm691_vm6, %v683_v35, %v699_v45 }
 0x143   :  { %v701_v39 = vmul.f32 0.2, %v685_v33  ;;  %vm693_vm1 = vcmp.gt.f32.partialorder %v685_v33, 0.0  ;;  %v703_v40 = vmul.f32 0.2, %v687_v34  ;;  %v686_v41 = vadd.f32 %v668_v23, %v586_v36 }
 0x144   :  { %v688_v42 = vadd.f32 %v676_v24, %v629_v37  ;;  %vm695_vm3 = vcmp.gt.f32.partialorder %v687_v34, 0.0  ;;  %v706_v51 = vsel %vm690_vm2, %v682_v29, %v698_v38  ;;  %v708_v55 = vsel %vm692_vm4, %v684_v32, %v700_v44 }
 0x145   :  { %vm694_vm5 = vcmp.gt.f32.partialorder %v686_v41, 0.0  ;;  %v702_v47 = vmul.f32 0.2, %v686_v41  ;;  %v709_v48 = vsel %vm693_vm1, %v685_v33, %v701_v39  ;;  %v711_v50 = vsel %vm695_vm3, %v687_v34, %v703_v40 }
 0x146   :  { %vm696_vm7 = vcmp.gt.f32.partialorder %v688_v42, 0.0  ;;  %v704_v49 = vmul.f32 0.2, %v688_v42  ;;  %v713_v59 = vpack.c.bf16 %v709_v48, %v705_v53  ;;  %v715_v62 = vpack.c.bf16 %v711_v50, %v707_v58 }
 0x147   :  { %v710_v52 = vsel %vm694_vm5, %v686_v41, %v702_v47 }
 0x148   :  { %v714_v54 = vpack.c.bf16 %v710_v52, %v706_v51  ;;  %v712_v56 = vsel %vm696_vm7, %v688_v42, %v704_v49  ;;  %v1594_v42 = vld [vmem:[#allocation3] ss:$0 sm:$0xff] }
 0x149   :  { %v716_v60 = vpack.c.bf16 %v712_v56, %v708_v55 }
 0x14a   :  { %1145 = vmatprep.mubr.bf16.mxu0 %v714_v54 }
 0x14b   :  { %1188 = vmatprep.mubr.bf16.mxu1 %v716_v60  ;;  %1146 = vmatmul.mubr.bf16.vlgmr.msra.gmra.mxu0 %v713_v59 }
 0x14c   :  { %1189 = vmatmul.mubr.bf16.vlgmr.msra.gmra.mxu1 %v715_v62  ;;  %1598 = vmatpush3.bf16.msra.mxu0 %v1827_v57 }
 0x14d   :  { %1599 = vmatprep.subr.bf16.mxu0 %v1828_v61 }
 0x150   :  { %1600 = vmatpush3.bf16.msra.mxu0 %v1829_v63 }
 0x151   :  { %1601 = vmatprep.subr.bf16.mxu0 %v1830_v0 }
 0x154   :  { %1602 = vmatpush3.bf16.msra.mxu0 %v1831_v1 }
 0x155   :  { %1603 = vmatprep.subr.bf16.mxu0 %v1832_v2 }
 0x158   :  { %1604 = vmatpush3.bf16.msra.mxu0 %v1833_v3 }
 0x159   :  { %1605 = vmatprep.subr.bf16.mxu0 %v1834_v4 }
 0x15c   :  { %1606 = vmatpush3.bf16.msra.mxu0 %v1835_v5 }
 0x15d   :  { %1607 = vmatprep.subr.bf16.mxu0 %v1836_v6 }
 0x160   :  { %1608 = vmatpush3.bf16.msra.mxu0 %v1837_v7 }
 0x161   :  { %1609 = vmatprep.subr.bf16.mxu0 %v1838_v8 }
 0x164   :  { %1610 = vmatpush3.bf16.msra.mxu0 %v1839_v9 }
 0x165   :  { %1611 = vmatprep.subr.bf16.mxu0 %v1840_v10 }
 0x168   :  { %1612 = vmatpush3.bf16.msra.mxu0 %v1841_v11 }
 0x20b   :  { %v1147_v16 = vpop.f32.mrf.mxu0 }
 0x20c   :  { %v1190_v18 = vpop.f32.mrf.mxu1  ;;  %v1148_v20 = vadd.f32 %v1147_v16, %v786_v13 }
 0x20d   :  { %v1149_v19 = vpop.f32.mrf.mxu0 }
 0x20e   :  { %v1150_v21 = vadd.f32 %v1149_v19, %v790_v14  ;;  %v1192_v22 = vpop.f32.mrf.mxu1  ;;  %v1191_v28 = vadd.f32 %v1190_v18, %v1148_v20 }
 0x20f   :  { %v1151_v23 = vpop.f32.mrf.mxu0 }
 0x210   :  { %v1152_v24 = vadd.f32 %v1151_v23, %v786_v13  ;;  %v1194_v25 = vpop.f32.mrf.mxu1  ;;  %v1193_v26 = vadd.f32 %v1192_v22, %v1150_v21  ;;  %v1203_v17 = vmul.f32 0.2, %v1191_v28  ;;  %vm1199_vm10 = vcmp.gt.f32.partialorder %v1191_v28, 0.0 }
 0x211   :  { %v1153_v27 = vpop.f32.mrf.mxu0 }
 0x212   :  { %v1195_v29 = vadd.f32 %v1194_v25, %v1152_v24  ;;  %v1154_v30 = vadd.f32 %v1153_v27, %v790_v14  ;;  %v1196_v32 = vpop.f32.mrf.mxu1  ;;  %v1204_v15 = vmul.f32 0.2, %v1193_v26  ;;  %vm1200_vm9 = vcmp.gt.f32.partialorder %v1193_v26, 0.0 }
 0x213   :  { %v1207_v37 = vsel %vm1199_vm10, %v1191_v28, %v1203_v17 }
 0x214   :  { %v1205_v31 = vmul.f32 0.2, %v1195_v29  ;;  %vm1201_vm8 = vcmp.gt.f32.partialorder %v1195_v29, 0.0  ;;  %v1197_v46 = vadd.f32 %v1196_v32, %v1154_v30  ;;  %v1208_v35 = vsel %vm1200_vm9, %v1193_v26, %v1204_v15 }
 0x216   :  { %vm1202_vm11 = vcmp.gt.f32.partialorder %v1197_v46, 0.0  ;;  %v1206_v33 = vmul.f32 0.2, %v1197_v46  ;;  %v1209_v34 = vsel %vm1201_vm8, %v1195_v29, %v1205_v31 }
 0x217   :  { %v1211_v39 = vpack.c.bf16 %v1209_v34, %v1207_v37 }
 0x218   :  { %v1210_v36 = vsel %vm1202_vm11, %v1197_v46, %v1206_v33 }
 0x219   :  { %v1212_v38 = vpack.c.bf16 %v1210_v36, %v1208_v35 }
 0x21b   :  { %1373 = vmatprep.mubr.bf16.mxu0 %v1212_v38 }
 0x21c   :  { %1374 = vmatmul.mubr.bf16.vlgmr.msra.gmra.mxu0 %v1211_v39 }
 0x2dc   :  { %v1613_v40 = vpop.f32.mrf.mxu0 }
 0x2de   :  { %v1614_v41 = vpop.f32.mrf.mxu0 }
 0x2df   :  { %v1615_v43 = vadd.f32 %v1614_v41, %v1613_v40 }
 0x2e0   :  { %v1616_v44 = vpop.f32.mrf.mxu0 }
 0x2e1   :  { %v1389_v45 = vadd.f32 %v1615_v43, %v1594_v42 }
 0x2e2   :  { %v1617_v47 = vpop.f32.mrf.mxu0 }
 0x2e3   :  { %v1595_v48 = vmul.f32 -1.442695, %v1389_v45  ;;  %v1618_v49 = vadd.f32 %v1617_v47, %v1616_v44 }
 0x2e5   :  { %1842 = vpow2.f32 %v1595_v48  ;;  %v1390_v50 = vadd.f32 %v1618_v49, %v1594_v42 }
 0x2e7   :  { %v1596_v51 = vmul.f32 -1.442695, %v1390_v50 }
 0x2e9   :  { %1844 = vpow2.f32 %v1596_v51 }
 0x2f2   :  { %v1843_v52 = vpop.eup %1842 }
 0x2f3   :  { %v1397_v53 = vadd.f32 1.0, %v1843_v52 }
 0x2f5   :  { %1846 = vrcp.f32 %v1397_v53 }
 0x2f6   :  { %v1845_v54 = vpop.eup %1844 }
 0x2f7   :  { %v1398_v55 = vadd.f32 1.0, %v1845_v54 }
 0x2f9   :  { %1848 = vrcp.f32 %v1398_v55 }
 0x302   :  { %v1847_v56 = vpop.eup %1846 }
 0x303   :  { %1404 = vst.msk [vmem:[#allocation11] sm:$0xff] %vm1403_vm12, %v1847_v56 }
 0x306   :  { %v1849_v57 = vpop.eup %1848 }
 0x30a   :  { %v1424_v58 = vld [vmem:[#allocation11] sm:$0x3] }
 0x30b   :  { %1425 = vst [vmem:[%s2036_s7] sm:$0x3] %v1424_v58 }
 0x30c   :  { %1443 = vsyncpa [#allocation5], 1 }
 0x30d   :  { %1444 = vsyncpa [#allocation7], 1 }
 0x30e   :  { %1445 = vsyncpa [#allocation10], 1 }

</bundles_post_ra>
